<compile_context>
chip_gen: v6e
topology: v6e:2x2x1
jax: 0.10.0
libtpu: 0.0.40
codegen_flags: <defaults>
</compile_context>

<pallas_src>
import functools

import jax
import jax.numpy as jnp
from jax.experimental import pallas as pl
from jax.experimental.pallas import tpu as pltpu

_LANES = 128
_SUBLANES = 8


def _round_up(x, m):
    return ((x + m - 1) // m) * m


def _tpu_vmem_capacity_bytes():
    try:
        return int(pltpu.get_tpu_info().vmem_capacity_bytes)
    except Exception:
        return 64 * 1024 * 1024  # conservative fallback (v7x per-TC VMEM)


def _vmem_limit(needed_bytes, vmem_cap):
    limit = int(needed_bytes * 1.3) + (2 << 20)
    limit = max(limit, 16 << 20)
    return int(min(limit, vmem_cap))


# --------------------------------------------------------------------------------------
# Kernels
# --------------------------------------------------------------------------------------
def _mlp_fused_kernel(x_ref, w0_ref, b0_ref, w_ref, b_ref, o_ref, *, num_rest: int):
    """All layers unrolled; all weights stay VMEM-resident across row blocks."""
    cdt = w0_ref.dtype  # compute dtype of the MXU operands (f32 or bf16)
    h = jnp.dot(x_ref[...].astype(cdt), w0_ref[...],
                preferred_element_type=jnp.float32) + b0_ref[...]
    h = jnp.maximum(h, 0.0)
    for i in range(num_rest):  # static unroll (small L); large L takes the layered path
        h = jnp.dot(h.astype(cdt), w_ref[i],
                    preferred_element_type=jnp.float32) + b_ref[i]
        if i < num_rest - 1:  # every layer but the last is followed by ReLU
            h = jnp.maximum(h, 0.0)
    o_ref[...] = h.astype(o_ref.dtype)


def _mlp_layered_kernel(x_ref, w0_ref, b0_ref, w_ref, b_ref, o_ref, h_ref):
    """Layer-pipelined variant: grid axis 1 walks layers; the per-layer weight slab is
    auto double-buffered by its BlockSpec; the activation lives in a VMEM scratch."""
    l = pl.program_id(1)
    last = pl.num_programs(1) - 1
    cdt = w0_ref.dtype

    @pl.when(l == 0)
    def _():
        h0 = jnp.dot(x_ref[...].astype(cdt), w0_ref[...],
                     preferred_element_type=jnp.float32) + b0_ref[...]
        h_ref[...] = jnp.maximum(h0, 0.0)

    h = jnp.dot(h_ref[...].astype(cdt), w_ref[0],
                preferred_element_type=jnp.float32) + b_ref[0]

    @pl.when(l < last)
    def _():
        h_ref[...] = jnp.maximum(h, 0.0)

    @pl.when(l == last)
    def _():
        o_ref[...] = h.astype(o_ref.dtype)


# --------------------------------------------------------------------------------------
# Parameter init / packing
# --------------------------------------------------------------------------------------
def init_mlp1_params(key, input_dim, dense_neuron, num_layers):
    """Deterministic PyTorch-style (uniform +/- 1/sqrt(fan_in)) Linear init.
    Returns a list of (w, b) at logical shapes, w stored [in, out]."""
    dims = [(input_dim, dense_neuron)]
    for _ in range(num_layers):
        dims.append((dense_neuron, dense_neuron))
    dims.append((dense_neuron, dense_neuron))

    params = []
    for fan_in, fan_out in dims:
        key, kw, kb = jax.random.split(key, 3)
        bound = 1.0 / jnp.sqrt(jnp.float32(fan_in))
        w = jax.random.uniform(kw, (fan_in, fan_out), jnp.float32, -bound, bound)
        b = jax.random.uniform(kb, (fan_out,), jnp.float32, -bound, bound)
        params.append((w, b))
    return params


def pack_mlp1_params(params, compute_dtype=jnp.float32):
    """Zero-pad to lane-dense widths; keep the (K_pad, F) first layer separate from the
    homogeneous (F, F) stack. Zero padding is exact: padded rows/cols/bias entries are 0,
    so padded lanes of the activation stay exactly 0 through every Linear + ReLU."""
    (w_first, b_first), rest = params[0], params[1:]
    K, D = w_first.shape
    K_pad = _round_up(K, _LANES)
    F = _round_up(D, _LANES)

    w0 = jnp.zeros((K_pad, F), jnp.float32).at[:K, :D].set(w_first).astype(compute_dtype)
    b0 = jnp.zeros((1, F), jnp.float32).at[0, :D].set(b_first)  # bias stays f32

    Lr = len(rest)
    w_stack = jnp.zeros((Lr, F, F), jnp.float32)
    b_stack = jnp.zeros((Lr, 1, F), jnp.float32)
    for i, (w, b) in enumerate(rest):
        ki, ko = w.shape
        w_stack = w_stack.at[i, :ki, :ko].set(w)
        b_stack = b_stack.at[i, 0, :ko].set(b)
    w_stack = w_stack.astype(compute_dtype)
    return w0, b0, w_stack, b_stack


# --------------------------------------------------------------------------------------
# Forward
# --------------------------------------------------------------------------------------
def mlp1_forward(x, packed, out_dim, *, force_layered=False):
    """Fused MLP1 forward (eval-mode: Dropout == identity)."""
    # TODO(synk): training-mode Dropout (pltpu.prng_seed + prng_random_bits mask) not
    # implemented; this matches the module's eval-mode forward.
    w0, b0, w_stack, b_stack = packed
    M, K = x.shape
    K_pad, F = w0.shape
    Lr = int(w_stack.shape[0])
    vmem_cap = _tpu_vmem_capacity_bytes()

    # ---- row tiling: >= 2 blocks whenever M > 8 (v7x megacore), big tiles for big M ----
    if M <= _SUBLANES:
        tm = _round_up(max(M, 1), _SUBLANES)
    else:
        tm_cap = 512 if F <= 512 else (256 if F <= 1024 else 128)
        tm = min(tm_cap, _round_up(pl.cdiv(M, 2), _SUBLANES))
    M_pad = _round_up(M, tm)
    num_blocks = M_pad // tm

    # Pad x only to (M_pad, K_pad) — never to the full hidden width F.
    if (M_pad, K_pad) != (M, K):
        x_in = jnp.pad(x, ((0, M_pad - M), (0, K_pad - K)))
    else:
        x_in = x

    param_bytes = sum(int(a.size) * a.dtype.itemsize for a in (w0, b0, w_stack, b_stack))
    io_bytes = 2 * tm * K_pad * x.dtype.itemsize + 2 * tm * F * 4
    use_layered = force_layered or Lr > 8 or param_bytes > vmem_cap // 2

    flops = 2 * M_pad * (K_pad * F + Lr * F * F)
    out_shape = jax.ShapeDtypeStruct((M_pad, F), x.dtype)

    if not use_layered:
        needed = param_bytes + io_bytes
        bytes_accessed = (x_in.size * x_in.dtype.itemsize + param_bytes + M_pad * F * 4)
        kernel = functools.partial(_mlp_fused_kernel, num_rest=Lr)
        out_pad = pl.pallas_call(
            kernel,
            out_shape=out_shape,
            grid=(num_blocks,),
            in_specs=[
                pl.BlockSpec((tm, K_pad), lambda i: (i, 0)),
                # grid-invariant parameters: single-buffered, VMEM-resident
                pl.BlockSpec((K_pad, F), lambda i: (0, 0), pipeline_mode=pl.Buffered(1)),
                pl.BlockSpec((1, F), lambda i: (0, 0), pipeline_mode=pl.Buffered(1)),
                pl.BlockSpec((Lr, F, F), lambda i: (0, 0, 0), pipeline_mode=pl.Buffered(1)),
                pl.BlockSpec((Lr, 1, F), lambda i: (0, 0, 0), pipeline_mode=pl.Buffered(1)),
            ],
            out_specs=pl.BlockSpec((tm, F), lambda i: (i, 0)),
            compiler_params=pltpu.CompilerParams(
                dimension_semantics=("parallel",),
                vmem_limit_bytes=_vmem_limit(needed, vmem_cap),
            ),
            cost_estimate=pl.CostEstimate(
                flops=flops, transcendentals=0, bytes_accessed=int(bytes_accessed)),
        )(x_in, w0, b0, w_stack, b_stack)
    else:
        wbytes = w0.dtype.itemsize
        first_bytes = w0.size * wbytes + b0.size * 4
        slab_bytes = F * F * wbytes + F * 4
        needed = first_bytes + 2 * slab_bytes + io_bytes + tm * F * 4  # + h scratch
        bytes_accessed = (x_in.size * x_in.dtype.itemsize + first_bytes
                          + num_blocks * Lr * slab_bytes + M_pad * F * 4)
        out_pad = pl.pallas_call(
            _mlp_layered_kernel,
            out_shape=out_shape,
            grid=(num_blocks, Lr),
            in_specs=[
                pl.BlockSpec((tm, K_pad), lambda i, l: (i, 0)),
                pl.BlockSpec((K_pad, F), lambda i, l: (0, 0), pipeline_mode=pl.Buffered(1)),
                pl.BlockSpec((1, F), lambda i, l: (0, 0), pipeline_mode=pl.Buffered(1)),
                # per-layer slabs: streamed + double-buffered along the layer axis
                pl.BlockSpec((1, F, F), lambda i, l: (l, 0, 0)),
                pl.BlockSpec((1, 1, F), lambda i, l: (l, 0, 0)),
            ],
            out_specs=pl.BlockSpec((tm, F), lambda i, l: (i, 0)),
            scratch_shapes=[pltpu.VMEM((tm, F), jnp.float32)],
            compiler_params=pltpu.CompilerParams(
                dimension_semantics=("parallel", "arbitrary"),
                vmem_limit_bytes=_vmem_limit(needed, vmem_cap),
            ),
            cost_estimate=pl.CostEstimate(
                flops=flops, transcendentals=0, bytes_accessed=int(bytes_accessed)),
        )(x_in, w0, b0, w_stack, b_stack)

    return out_pad[:M, :out_dim]


if __name__ == "__main__":
    key = jax.random.PRNGKey(0)
    key, kx, kx2 = jax.random.split(key, 3)

    input_dim = 16
    model_params = {
        "inner_dense_neuron": 32,
        "inner_num_layers": 2,
        "inner_dropout_mlp": 0.1,
    }
    d = model_params["inner_dense_neuron"]

    params = init_mlp1_params(key, input_dim, d, model_params["inner_num_layers"])

    def reference(xv):
        # eval-mode forward: Dropout == identity
        h = xv
        for i, (w, b) in enumerate(params):
            h = h @ w + b
            if i < len(params) - 1:
                h = jnp.maximum(h, 0.0)
        return h

    # --- run 1: f32 weights, fully fused (all weights VMEM-resident, single-buffered) ---
    x = jax.random.normal(kx, (8, input_dim), jnp.float32)
    packed_f32 = pack_mlp1_params(params, jnp.float32)
    out = jax.block_until_ready(mlp1_forward(x, packed_f32, d))
    ref = reference(x)
    assert out.shape == (8, d)
    assert jnp.allclose(out, ref, atol=1e-4, rtol=1e-4), "f32 fused mismatch"

    # --- run 2: bf16 weights/activations on the MXU, f32 accumulation ---
    packed_bf16 = pack_mlp1_params(params, jnp.bfloat16)
    out_bf16 = jax.block_until_ready(mlp1_forward(x, packed_bf16, d))
    assert jnp.allclose(out_bf16, ref, atol=5e-2, rtol=5e-2), "bf16 fused mismatch"

    # --- run 3: layer-pipelined path (forced) + multi-row-block grid + row padding ---
    x2 = jax.random.normal(kx2, (40, input_dim), jnp.float32)
    out2 = jax.block_until_ready(mlp1_forward(x2, packed_f32, d, force_layered=True))
    ref2 = reference(x2)
    assert out2.shape == (40, d)
    assert jnp.allclose(out2, ref2, atol=1e-4, rtol=1e-4), "layered path mismatch"

    print("KERNEL_OK")
</pallas_src>

<mosaic_0001>
module attributes {stable_mosaic.version = 11 : i64} {
  func.func @_mlp_fused_kernel(%arg0: i32, %arg1: memref<8x128xf32, #tpu.memory_space<vmem>>, %arg2: memref<128x128xf32, #tpu.memory_space<vmem>>, %arg3: memref<1x128xf32, #tpu.memory_space<vmem>>, %arg4: memref<3x128x128xf32, #tpu.memory_space<vmem>>, %arg5: memref<3x1x128xf32, #tpu.memory_space<vmem>>, %arg6: memref<8x128xf32, #tpu.memory_space<vmem>>) attributes {dimension_semantics = [#tpu.dimension_semantics<parallel>], iteration_bounds = array<i64: 1>, scalar_prefetch = 0 : i64, scratch_operands = 0 : i64, tpu.core_type = #tpu.core_type<tc>, window_params = [{transform_indices = @transform_0, window_bounds = array<i64: 8, 128>}, {pipeline_mode = #tpu.pipeline_mode<synchronous>, transform_indices = @transform_1, window_bounds = array<i64: 128, 128>}, {pipeline_mode = #tpu.pipeline_mode<synchronous>, transform_indices = @transform_2, window_bounds = array<i64: 1, 128>}, {pipeline_mode = #tpu.pipeline_mode<synchronous>, transform_indices = @transform_3, window_bounds = array<i64: 3, 128, 128>}, {pipeline_mode = #tpu.pipeline_mode<synchronous>, transform_indices = @transform_4, window_bounds = array<i64: 3, 1, 128>}, {transform_indices = @transform_5, window_bounds = array<i64: 8, 128>}]} {
    %c0 = arith.constant 0 : index
    %c0_0 = arith.constant 0 : index
    %0 = vector.load %arg1[%c0, %c0_0] : memref<8x128xf32, #tpu.memory_space<vmem>>, vector<8x128xf32>
    %c0_1 = arith.constant 0 : index
    %c0_2 = arith.constant 0 : index
    %1 = vector.load %arg2[%c0_1, %c0_2] : memref<128x128xf32, #tpu.memory_space<vmem>>, vector<128x128xf32>
    %cst = arith.constant dense<0.000000e+00> : vector<8x128xf32>
    %2 = tpu.matmul %0, %1, %cst {dimension_numbers = #tpu.dot_dimension_numbers<[1], [0], [0], [1], [0, 0, 1, 1], [], []>} : vector<8x128xf32>, vector<128x128xf32>, vector<8x128xf32> -> vector<8x128xf32>
    %c0_3 = arith.constant 0 : index
    %c0_4 = arith.constant 0 : index
    %3 = vector.load %arg3[%c0_3, %c0_4] : memref<1x128xf32, #tpu.memory_space<vmem>>, vector<1x128xf32>
    %4 = vector.broadcast %3 : vector<1x128xf32> to vector<8x128xf32>
    %5 = arith.addf %2, %4 : vector<8x128xf32>
    %cst_5 = arith.constant 0.000000e+00 : f32
    %6 = vector.broadcast %cst_5 : f32 to vector<8x128xf32>
    %7 = arith.maximumf %5, %6 : vector<8x128xf32>
    %c0_6 = arith.constant 0 : index
    %c0_7 = arith.constant 0 : index
    %c0_8 = arith.constant 0 : index
    %8 = vector.load %arg4[%c0_6, %c0_7, %c0_8] : memref<3x128x128xf32, #tpu.memory_space<vmem>>, vector<1x128x128xf32>
    %9 = vector.shape_cast %8 : vector<1x128x128xf32> to vector<128x128xf32>
    %cst_9 = arith.constant dense<0.000000e+00> : vector<8x128xf32>
    %10 = tpu.matmul %7, %9, %cst_9 {dimension_numbers = #tpu.dot_dimension_numbers<[1], [0], [0], [1], [0, 0, 1, 1], [], []>} : vector<8x128xf32>, vector<128x128xf32>, vector<8x128xf32> -> vector<8x128xf32>
    %c0_10 = arith.constant 0 : index
    %c0_11 = arith.constant 0 : index
    %c0_12 = arith.constant 0 : index
    %11 = vector.load %arg5[%c0_10, %c0_11, %c0_12] : memref<3x1x128xf32, #tpu.memory_space<vmem>>, vector<1x1x128xf32>
    %12 = vector.shape_cast %11 : vector<1x1x128xf32> to vector<1x128xf32>
    %13 = vector.broadcast %12 : vector<1x128xf32> to vector<8x128xf32>
    %14 = arith.addf %10, %13 : vector<8x128xf32>
    %cst_13 = arith.constant 0.000000e+00 : f32
    %15 = vector.broadcast %cst_13 : f32 to vector<8x128xf32>
    %16 = arith.maximumf %14, %15 : vector<8x128xf32>
    %c1 = arith.constant 1 : index
    %c0_14 = arith.constant 0 : index
    %c0_15 = arith.constant 0 : index
    %17 = vector.load %arg4[%c1, %c0_14, %c0_15] : memref<3x128x128xf32, #tpu.memory_space<vmem>>, vector<1x128x128xf32>
    %18 = vector.shape_cast %17 : vector<1x128x128xf32> to vector<128x128xf32>
    %cst_16 = arith.constant dense<0.000000e+00> : vector<8x128xf32>
    %19 = tpu.matmul %16, %18, %cst_16 {dimension_numbers = #tpu.dot_dimension_numbers<[1], [0], [0], [1], [0, 0, 1, 1], [], []>} : vector<8x128xf32>, vector<128x128xf32>, vector<8x128xf32> -> vector<8x128xf32>
    %c1_17 = arith.constant 1 : index
    %c0_18 = arith.constant 0 : index
    %c0_19 = arith.constant 0 : index
    %20 = vector.load %arg5[%c1_17, %c0_18, %c0_19] : memref<3x1x128xf32, #tpu.memory_space<vmem>>, vector<1x1x128xf32>
    %21 = vector.shape_cast %20 : vector<1x1x128xf32> to vector<1x128xf32>
    %22 = vector.broadcast %21 : vector<1x128xf32> to vector<8x128xf32>
    %23 = arith.addf %19, %22 : vector<8x128xf32>
    %cst_20 = arith.constant 0.000000e+00 : f32
    %24 = vector.broadcast %cst_20 : f32 to vector<8x128xf32>
    %25 = arith.maximumf %23, %24 : vector<8x128xf32>
    %c2 = arith.constant 2 : index
    %c0_21 = arith.constant 0 : index
    %c0_22 = arith.constant 0 : index
    %26 = vector.load %arg4[%c2, %c0_21, %c0_22] : memref<3x128x128xf32, #tpu.memory_space<vmem>>, vector<1x128x128xf32>
    %27 = vector.shape_cast %26 : vector<1x128x128xf32> to vector<128x128xf32>
    %cst_23 = arith.constant dense<0.000000e+00> : vector<8x128xf32>
    %28 = tpu.matmul %25, %27, %cst_23 {dimension_numbers = #tpu.dot_dimension_numbers<[1], [0], [0], [1], [0, 0, 1, 1], [], []>} : vector<8x128xf32>, vector<128x128xf32>, vector<8x128xf32> -> vector<8x128xf32>
    %c2_24 = arith.constant 2 : index
    %c0_25 = arith.constant 0 : index
    %c0_26 = arith.constant 0 : index
    %29 = vector.load %arg5[%c2_24, %c0_25, %c0_26] : memref<3x1x128xf32, #tpu.memory_space<vmem>>, vector<1x1x128xf32>
    %30 = vector.shape_cast %29 : vector<1x1x128xf32> to vector<1x128xf32>
    %31 = vector.broadcast %30 : vector<1x128xf32> to vector<8x128xf32>
    %32 = arith.addf %28, %31 : vector<8x128xf32>
    %c0_27 = arith.constant 0 : index
    %c0_28 = arith.constant 0 : index
    %33 = vector.load %arg6[%c0_27, %c0_28] : memref<8x128xf32, #tpu.memory_space<vmem>>, vector<8x128xf32>
    tpu.vector_store %arg6[%c0_27, %c0_28], %32 {strides = array<i32>} : memref<8x128xf32, #tpu.memory_space<vmem>>, vector<8x128xf32>,
    return
  }
  func.func @transform_0(%arg0: i32) -> (i32, i32) {
    %c0_i32 = arith.constant 0 : i32
    %c0_i32_0 = arith.constant 0 : i32
    return %arg0, %c0_i32 : i32, i32
  }
  func.func @transform_1(%arg0: i32) -> (i32, i32) {
    %c0_i32 = arith.constant 0 : i32
    %c0_i32_0 = arith.constant 0 : i32
    %c0_i32_1 = arith.constant 0 : i32
    return %c0_i32, %c0_i32_0 : i32, i32
  }
  func.func @transform_2(%arg0: i32) -> (i32, i32) {
    %c0_i32 = arith.constant 0 : i32
    %c0_i32_0 = arith.constant 0 : i32
    %c0_i32_1 = arith.constant 0 : i32
    return %c0_i32, %c0_i32_0 : i32, i32
  }
  func.func @transform_3(%arg0: i32) -> (i32, i32, i32) {
    %c0_i32 = arith.constant 0 : i32
    %c0_i32_0 = arith.constant 0 : i32
    %c0_i32_1 = arith.constant 0 : i32
    %c0_i32_2 = arith.constant 0 : i32
    return %c0_i32, %c0_i32_0, %c0_i32_1 : i32, i32, i32
  }
  func.func @transform_4(%arg0: i32) -> (i32, i32, i32) {
    %c0_i32 = arith.constant 0 : i32
    %c0_i32_0 = arith.constant 0 : i32
    %c0_i32_1 = arith.constant 0 : i32
    %c0_i32_2 = arith.constant 0 : i32
    return %c0_i32, %c0_i32_0, %c0_i32_1 : i32, i32, i32
  }
  func.func @transform_5(%arg0: i32) -> (i32, i32) {
    %c0_i32 = arith.constant 0 : i32
    %c0_i32_0 = arith.constant 0 : i32
    return %arg0, %c0_i32 : i32, i32
  }
}

</mosaic_0001>

<bundles_post_ra>
// kernel: tpu_custom_call.1
= control target key start
LH: loop header
LB: loop body
LE: loop exit
PB: predicated region body
PF: predicated region fallthrough
CT: control target
= control target key end

     0   :  { %10 = vsyncpa [#allocation3], 0  ;;  %s899_s0 = inlined_call_operand.hbm [shape: f32[8,128], index: 0, kind: input, shape index: {}]   ;;  %s900_s1 = inlined_call_operand.hbm [shape: f32[128,128], index: 1, kind: input, shape index: {}]   ;;  %s901_s2 = inlined_call_operand.vmem [shape: f32[1,128], index: 2, kind: input, shape index: {}]   ;;  %s902_s3 = inlined_call_operand.hbm [shape: f32[3,128,128], index: 3, kind: input, shape index: {}]   ;;  %s903_s4 = inlined_call_operand.vmem [shape: f32[3,1,128], index: 4, kind: input, shape index: {}]   ;;  %s904_s5 = inlined_call_operand.hbm [shape: f32[8,128], index: 5, kind: output, shape index: {}]  }
   0x1   :  { %11 = vsyncpa [#allocation6], 0 }
   0x2   :  { %12 = vsyncpa [#allocation4], 0  ;;  %s765_s18 = smov [#allocation5]  }
   0x3   :  { %s28_s19 = sshll.u32 %s765_s18, 4  ;;  %s29_s19 = int_to_ptr.vmem [resolvable:$true] %s28_s19 }
   0x4   :  { %s687_s20 = scalar_lea.vmem %s29_s19, 2048  ;;  %p692_p1 = scmp.lt.s32.totalorder %s29_s19, %s29_s19 }
   0x5   :  { %p688_p0 = scmp.ne.s32.totalorder %s29_s19, %s687_s20  ;;  %p693_p2 = scmp.lt.s32.totalorder %s687_s20, %s687_s20 }
   0x7   :  { %p694_p3 = por %p693_p2, %p692_p1 }
   0x9   :  { %p695_p4 = pnand %p694_p3, %p688_p0 }
   0xb   :  { %698 = shalt.err (!%p695_p4)
}
   0xc   :  { %s766_s21 = smov 128   ;;  %s767_s22 = smov 8  }
   0xd   :  { %34 = dma.hbm_to_vmem [thread:$0]  %s900_s1, 2048, %s29_s19, [#allocation6], %s766_s21, %s766_s21, %s767_s22  }
   0xe   :  { %s768_s25 = smov [#allocation2]   ;;  %s769_s27 = smov [#allocation7]  }
   0xf   :  { %s19_s26 = sshll.u32 %s768_s25, 4  ;;  %s42_s28 = sshll.u32 %s769_s27, 4  ;;  %s20_s26 = int_to_ptr.vmem [resolvable:$true] %s19_s26  ;;  %s43_s28 = int_to_ptr.vmem [resolvable:$true] %s42_s28 }
  0x10   :  { %s707_s29 = scalar_lea.vmem %s20_s26, 128  ;;  %p712_p6 = scmp.lt.s32.totalorder %s20_s26, %s20_s26 }
  0x11   :  { %p708_p5 = scmp.ne.s32.totalorder %s20_s26, %s707_s29  ;;  %p713_p7 = scmp.lt.s32.totalorder %s707_s29, %s707_s29 }
  0x13   :  { %p714_p8 = por %p713_p7, %p712_p6 }
  0x15   :  { %p715_p9 = pnand %p714_p8, %p708_p5 }
  0x17   :  { %718 = shalt.err (!%p715_p9)
}
  0x18   :  { %22 = dma.hbm_to_vmem [thread:$0]  %s899_s0, 128, %s20_s26, [#allocation3]  }
  0x19   :  { %s727_s7 = scalar_lea.vmem %s43_s28, 6144  ;;  %p732_p11 = scmp.lt.s32.totalorder %s43_s28, %s43_s28 }
  0x1a   :  { %p728_p10 = scmp.ne.s32.totalorder %s43_s28, %s727_s7  ;;  %p733_p12 = scmp.lt.s32.totalorder %s727_s7, %s727_s7 }
  0x1c   :  { %p734_p13 = por %p733_p12, %p732_p11 }
  0x1e   :  { %p735_p0 = pnand %p734_p13, %p728_p10 }
  0x20   :  { %738 = shalt.err (!%p735_p0)
}
  0x21   :  { %48 = dma.hbm_to_vmem [thread:$0]  %s902_s3, 6144, %s43_s28, [#allocation6], %s766_s21, %s766_s21, %s767_s22  }
  0x22   :  { %759 = dma.done.wait [#allocation3], 128  }
  0x23   :  { %760 = vsyncadd [#allocation3], 4294967168 }
  0x24   :  { %761 = dma.done.wait [#allocation6], 8192  }
  0x25   :  { %762 = vsyncadd [#allocation6], 4294959104  ;;  %v770_v0 = vmov 0.0   ;;  %vm771_vm0 = vmmov 0   ;;  %v76_v1 = vld [vmem:[#allocation5 + $0x78] sm:$0xff]  ;;  %v75_v2 = vld [vmem:[#allocation5 + $0x70] sm:$0xff] }
  0x26   :  { %531 = vmatprep.subr.mxu0 %v770_v0  ;;  %563 = vmatprep.mubr.msk.f32.mxu0 %vm771_vm0, %v770_v0  ;;  %v74_v3 = vld [vmem:[#allocation5 + $0x68] sm:$0xff]  ;;  %v73_v4 = vld [vmem:[#allocation5 + $0x60] sm:$0xff]  ;;  %v170_v5 = vld [vmem:[#allocation7 + $0x78] sm:$0xff]  ;;  %s772_s14 = smov [#allocation8]  }
  0x27   :  { %566 = vmatprep.subr.mxu1 %v770_v0  ;;  %598 = vmatprep.mubr.msk.f32.mxu1 %vm771_vm0, %v770_v0  ;;  %v72_v6 = vld [vmem:[#allocation5 + $0x58] sm:$0xff]  ;;  %v169_v7 = vld [vmem:[#allocation7 + $0x70] sm:$0xff]  ;;  %v168_v8 = vld [vmem:[#allocation7 + $0x68] sm:$0xff]  ;;  %s447_s15 = sshll.u32 %s772_s14, 4  ;;  %s448_s15 = int_to_ptr.vmem [resolvable:$true] %s447_s15 }
  0x28   :  { %532 = vmatpush3.msra.mxu0 %v76_v1  ;;  %567 = vmatpush3.msra.mxu1 %v170_v5  ;;  %v71_v9 = vld [vmem:[#allocation5 + $0x50] sm:$0xff]  ;;  %v167_v10 = vld [vmem:[#allocation7 + $0x60] sm:$0xff]  ;;  %v70_v11 = vld [vmem:[#allocation5 + $0x48] sm:$0xff]  ;;  %s739_s16 = scalar_lea.vmem %s448_s15, 128  ;;  %p744_p2 = scmp.lt.s32.totalorder %s448_s15, %s448_s15 }
  0x29   :  { %533 = vmatprep.subr.mxu0 %v770_v0  ;;  %568 = vmatprep.subr.mxu1 %v770_v0  ;;  %v166_v12 = vld [vmem:[#allocation7 + $0x58] sm:$0xff]  ;;  %v69_v13 = vld [vmem:[#allocation5 + $0x40] sm:$0xff]  ;;  %v165_v14 = vld [vmem:[#allocation7 + $0x50] sm:$0xff]  ;;  %p740_p1 = scmp.ne.s32.totalorder %s448_s15, %s739_s16  ;;  %p745_p3 = scmp.lt.s32.totalorder %s739_s16, %s739_s16 }
  0x2a   :  { %534 = vmatpush3.msra.mxu0 %v75_v2  ;;  %569 = vmatpush3.msra.mxu1 %v169_v7  ;;  %v68_v15 = vld [vmem:[#allocation5 + $0x38] sm:$0xff]  ;;  %v164_v16 = vld [vmem:[#allocation7 + $0x48] sm:$0xff]  ;;  %v67_v17 = vld [vmem:[#allocation5 + $0x30] sm:$0xff] }
  0x2b   :  { %535 = vmatprep.subr.mxu0 %v770_v0  ;;  %570 = vmatprep.subr.mxu1 %v770_v0  ;;  %v163_v18 = vld [vmem:[#allocation7 + $0x40] sm:$0xff]  ;;  %v66_v19 = vld [vmem:[#allocation5 + $0x28] sm:$0xff]  ;;  %v162_v20 = vld [vmem:[#allocation7 + $0x38] sm:$0xff]  ;;  %p746_p4 = por %p745_p3, %p744_p2 }
  0x2c   :  { %536 = vmatpush3.msra.mxu0 %v74_v3  ;;  %571 = vmatpush3.msra.mxu1 %v168_v8  ;;  %v65_v21 = vld [vmem:[#allocation5 + $0x20] sm:$0xff]  ;;  %v161_v22 = vld [vmem:[#allocation7 + $0x30] sm:$0xff]  ;;  %v64_v23 = vld [vmem:[#allocation5 + $0x18] sm:$0xff] }
  0x2d   :  { %537 = vmatprep.subr.mxu0 %v770_v0  ;;  %572 = vmatprep.subr.mxu1 %v770_v0  ;;  %v160_v24 = vld [vmem:[#allocation7 + $0x28] sm:$0xff]  ;;  %v63_v25 = vld [vmem:[#allocation5 + $0x10] sm:$0xff]  ;;  %v159_v26 = vld [vmem:[#allocation7 + $0x20] sm:$0xff]  ;;  %p747_p5 = pnand %p746_p4, %p740_p1 }
  0x2e   :  { %538 = vmatpush3.msra.mxu0 %v73_v4  ;;  %573 = vmatpush3.msra.mxu1 %v167_v10  ;;  %v62_v27 = vld [vmem:[#allocation5 + $0x8] sm:$0xff]  ;;  %v158_v28 = vld [vmem:[#allocation7 + $0x18] sm:$0xff]  ;;  %v61_v29 = vld [vmem:[#allocation5] sm:$0xff] }
  0x2f   :  { %539 = vmatprep.subr.mxu0 %v770_v0  ;;  %574 = vmatprep.subr.mxu1 %v770_v0  ;;  %v60_v30 = vld [vmem:[#allocation2] sm:$0xff]  ;;  %v157_v31 = vld [vmem:[#allocation7 + $0x10] sm:$0xff]  ;;  %v156_v32 = vld [vmem:[#allocation7 + $0x8] sm:$0xff] }
  0x30   :  { %540 = vmatpush3.msra.mxu0 %v72_v6  ;;  %575 = vmatpush3.msra.mxu1 %v166_v12  ;;  %v155_v33 = vld [vmem:[#allocation7] sm:$0xff]  ;;  %v265_v34 = vld [vmem:[#allocation7 + $0xf8] sm:$0xff]  ;;  %v264_v35 = vld [vmem:[#allocation7 + $0xf0] sm:$0xff] }
  0x31   :  { %541 = vmatprep.subr.mxu0 %v770_v0  ;;  %576 = vmatprep.subr.mxu1 %v770_v0  ;;  %v263_v36 = vld [vmem:[#allocation7 + $0xe8] sm:$0xff]  ;;  %v262_v37 = vld [vmem:[#allocation7 + $0xe0] sm:$0xff]  ;;  %v261_v38 = vld [vmem:[#allocation7 + $0xd8] sm:$0xff] }
  0x32   :  { %542 = vmatpush3.msra.mxu0 %v71_v9  ;;  %577 = vmatpush3.msra.mxu1 %v165_v14  ;;  %v260_v39 = vld [vmem:[#allocation7 + $0xd0] sm:$0xff]  ;;  %v259_v40 = vld [vmem:[#allocation7 + $0xc8] sm:$0xff]  ;;  %v258_v41 = vld [vmem:[#allocation7 + $0xc0] sm:$0xff] }
  0x33   :  { %543 = vmatprep.subr.mxu0 %v770_v0  ;;  %578 = vmatprep.subr.mxu1 %v770_v0  ;;  %v257_v42 = vld [vmem:[#allocation7 + $0xb8] sm:$0xff]  ;;  %v256_v43 = vld [vmem:[#allocation7 + $0xb0] sm:$0xff]  ;;  %v255_v44 = vld [vmem:[#allocation7 + $0xa8] sm:$0xff] }
  0x34   :  { %544 = vmatpush3.msra.mxu0 %v70_v11  ;;  %579 = vmatpush3.msra.mxu1 %v164_v16  ;;  %v254_v45 = vld [vmem:[#allocation7 + $0xa0] sm:$0xff]  ;;  %v253_v46 = vld [vmem:[#allocation7 + $0x98] sm:$0xff]  ;;  %v252_v52 = vld [vmem:[#allocation7 + $0x90] sm:$0xff] }
  0x35   :  { %545 = vmatprep.subr.mxu0 %v770_v0  ;;  %580 = vmatprep.subr.mxu1 %v770_v0  ;;  %v457_v47 = vld [vmem:[%s901_s2] ss:$0 sm:$0xff]  ;;  %v251_v53 = vld [vmem:[#allocation7 + $0x88] sm:$0xff]  ;;  %v250_v54 = vld [vmem:[#allocation7 + $0x80] sm:$0xff] }
  0x36   :  { %546 = vmatpush3.msra.mxu0 %v69_v13  ;;  %581 = vmatpush3.msra.mxu1 %v163_v18  ;;  %v361_v55 = vld [vmem:[#allocation7 + $0x178] sm:$0xff]  ;;  %v360_v56 = vld [vmem:[#allocation7 + $0x170] sm:$0xff]  ;;  %v359_v57 = vld [vmem:[#allocation7 + $0x168] sm:$0xff] }
  0x37   :  { %547 = vmatprep.subr.mxu0 %v770_v0  ;;  %582 = vmatprep.subr.mxu1 %v770_v0  ;;  %v358_v58 = vld [vmem:[#allocation7 + $0x160] sm:$0xff]  ;;  %v357_v59 = vld [vmem:[#allocation7 + $0x158] sm:$0xff]  ;;  %v356_v60 = vld [vmem:[#allocation7 + $0x150] sm:$0xff] }
  0x38   :  { %548 = vmatpush3.msra.mxu0 %v68_v15  ;;  %583 = vmatpush3.msra.mxu1 %v162_v20  ;;  %v355_v61 = vld [vmem:[#allocation7 + $0x148] sm:$0xff]  ;;  %v354_v62 = vld [vmem:[#allocation7 + $0x140] sm:$0xff]  ;;  %v353_v63 = vld [vmem:[#allocation7 + $0x138] sm:$0xff] }
  0x39   :  { %549 = vmatprep.subr.mxu0 %v770_v0  ;;  %584 = vmatprep.subr.mxu1 %v770_v0  ;;  %v352_v1 = vld [vmem:[#allocation7 + $0x130] sm:$0xff]  ;;  %v351_v2 = vld [vmem:[#allocation7 + $0x128] sm:$0xff]  ;;  %v350_v3 = vld [vmem:[#allocation7 + $0x120] sm:$0xff] }
  0x3a   :  { %550 = vmatpush3.msra.mxu0 %v67_v17  ;;  %585 = vmatpush3.msra.mxu1 %v161_v22  ;;  %v349_v4 = vld [vmem:[#allocation7 + $0x118] sm:$0xff]  ;;  %v348_v10 = vld [vmem:[#allocation7 + $0x110] sm:$0xff]  ;;  %v347_v11 = vld [vmem:[#allocation7 + $0x108] sm:$0xff] }
  0x3b   :  { %551 = vmatprep.subr.mxu0 %v770_v0  ;;  %586 = vmatprep.subr.mxu1 %v770_v0  ;;  %v458_v5 = vld [vmem:[%s903_s4] ss:$0 sm:$0xff]  ;;  %v346_v12 = vld [vmem:[#allocation7 + $0x100] sm:$0xff]  ;;  %v460_v13 = vld [vmem:[%s903_s4 + $0x1] ss:$0 sm:$0xff] }
  0x3c   :  { %552 = vmatpush3.msra.mxu0 %v66_v19  ;;  %587 = vmatpush3.msra.mxu1 %v160_v24  ;;  %v462_v18 = vld [vmem:[%s903_s4 + $0x2] ss:$0 sm:$0xff] }
  0x3d   :  { %553 = vmatprep.subr.mxu0 %v770_v0  ;;  %588 = vmatprep.subr.mxu1 %v770_v0 }
  0x3e   :  { %554 = vmatpush3.msra.mxu0 %v65_v21  ;;  %589 = vmatpush3.msra.mxu1 %v159_v26 }
  0x3f   :  { %555 = vmatprep.subr.mxu0 %v770_v0  ;;  %590 = vmatprep.subr.mxu1 %v770_v0 }
  0x40   :  { %556 = vmatpush3.msra.mxu0 %v64_v23  ;;  %591 = vmatpush3.msra.mxu1 %v158_v28 }
  0x41   :  { %557 = vmatprep.subr.mxu0 %v770_v0  ;;  %592 = vmatprep.subr.mxu1 %v770_v0 }
  0x42   :  { %558 = vmatpush3.msra.mxu0 %v63_v25  ;;  %593 = vmatpush3.msra.mxu1 %v157_v31 }
  0x43   :  { %559 = vmatprep.subr.mxu0 %v770_v0  ;;  %594 = vmatprep.subr.mxu1 %v770_v0 }
  0x44   :  { %560 = vmatpush3.msra.mxu0 %v62_v27  ;;  %595 = vmatpush3.msra.mxu1 %v156_v32 }
  0x45   :  { %561 = vmatprep.subr.mxu0 %v770_v0  ;;  %596 = vmatprep.subr.mxu1 %v770_v0 }
  0x46   :  { %562 = vmatpush3.msra.mxu0 %v61_v29  ;;  %597 = vmatpush3.msra.mxu1 %v155_v33 }
  0x47   :  { %564 = vmatmul.mubr.f32.vlgmr.msra.gmra.mxu0 %v60_v30  ;;  %601 = vmatprep.subr.mxu0 %v770_v0 }
  0x48   :  { %633 = vmatprep.mubr.msk.f32.mxu0 %vm771_vm0, %v770_v0  ;;  %636 = vmatprep.subr.mxu1 %v770_v0 }
  0x49   :  { %602 = vmatpush3.msra.mxu0 %v265_v34 }
  0x4a   :  { %603 = vmatprep.subr.mxu0 %v770_v0 }
  0x4b   :  { %604 = vmatpush3.msra.mxu0 %v264_v35 }
  0x4c   :  { %605 = vmatprep.subr.mxu0 %v770_v0 }
  0x4d   :  { %606 = vmatpush3.msra.mxu0 %v263_v36 }
  0x4e   :  { %607 = vmatprep.subr.mxu0 %v770_v0 }
  0x4f   :  { %608 = vmatpush3.msra.mxu0 %v262_v37 }
  0x50   :  { %609 = vmatprep.subr.mxu0 %v770_v0 }
  0x51   :  { %610 = vmatpush3.msra.mxu0 %v261_v38 }
  0x52   :  { %611 = vmatprep.subr.mxu0 %v770_v0 }
  0x53   :  { %612 = vmatpush3.msra.mxu0 %v260_v39 }
  0x54   :  { %613 = vmatprep.subr.mxu0 %v770_v0 }
  0x55   :  { %614 = vmatpush3.msra.mxu0 %v259_v40 }
  0x56   :  { %615 = vmatprep.subr.mxu0 %v770_v0 }
  0x57   :  { %616 = vmatpush3.msra.mxu0 %v258_v41 }
  0x58   :  { %617 = vmatprep.subr.mxu0 %v770_v0 }
  0x59   :  { %618 = vmatpush3.msra.mxu0 %v257_v42 }
  0x5a   :  { %619 = vmatprep.subr.mxu0 %v770_v0 }
  0x5b   :  { %620 = vmatpush3.msra.mxu0 %v256_v43 }
  0x5c   :  { %621 = vmatprep.subr.mxu0 %v770_v0 }
  0x5d   :  { %622 = vmatpush3.msra.mxu0 %v255_v44 }
  0x5e   :  { %623 = vmatprep.subr.mxu0 %v770_v0 }
  0x5f   :  { %624 = vmatpush3.msra.mxu0 %v254_v45 }
  0x60   :  { %625 = vmatprep.subr.mxu0 %v770_v0 }
  0x61   :  { %626 = vmatpush3.msra.mxu0 %v253_v46 }
  0x62   :  { %627 = vmatprep.subr.mxu0 %v770_v0 }
  0x63   :  { %628 = vmatpush3.msra.mxu0 %v252_v52 }
  0x64   :  { %629 = vmatprep.subr.mxu0 %v770_v0 }
  0x65   :  { %630 = vmatpush3.msra.mxu0 %v251_v53 }
  0x66   :  { %631 = vmatprep.subr.mxu0 %v770_v0 }
  0x67   :  { %632 = vmatpush3.msra.mxu0 %v250_v54 }
 0x107   :  { %v150_v48 = vpop.f32.mrf.mxu0 }
 0x108   :  { %v151_v49 = vadd.f32 %v457_v47, %v150_v48 }
 0x109   :  { %v565_v50 = vpop.f32.mrf.mxu0 }
 0x10a   :  { %v154_v51 = vmax.f32 %v151_v49, 0.0 }
 0x10c   :  { %599 = vmatmul.mubr.f32.vlgmr.msra.gmra.mxu1 %v154_v51 }
 0x10d   :  { %668 = vmatprep.mubr.msk.f32.mxu1 %vm771_vm0, %v770_v0  ;;  %637 = vmatpush3.msra.mxu1 %v361_v55 }
 0x10e   :  { %638 = vmatprep.subr.mxu1 %v770_v0 }
 0x10f   :  { %639 = vmatpush3.msra.mxu1 %v360_v56 }
 0x110   :  { %640 = vmatprep.subr.mxu1 %v770_v0 }
 0x111   :  { %641 = vmatpush3.msra.mxu1 %v359_v57 }
 0x112   :  { %642 = vmatprep.subr.mxu1 %v770_v0 }
 0x113   :  { %643 = vmatpush3.msra.mxu1 %v358_v58 }
 0x114   :  { %644 = vmatprep.subr.mxu1 %v770_v0 }
 0x115   :  { %645 = vmatpush3.msra.mxu1 %v357_v59 }
 0x116   :  { %646 = vmatprep.subr.mxu1 %v770_v0 }
 0x117   :  { %647 = vmatpush3.msra.mxu1 %v356_v60 }
 0x118   :  { %648 = vmatprep.subr.mxu1 %v770_v0 }
 0x119   :  { %649 = vmatpush3.msra.mxu1 %v355_v61 }
 0x11a   :  { %650 = vmatprep.subr.mxu1 %v770_v0 }
 0x11b   :  { %651 = vmatpush3.msra.mxu1 %v354_v62 }
 0x11c   :  { %652 = vmatprep.subr.mxu1 %v770_v0 }
 0x11d   :  { %653 = vmatpush3.msra.mxu1 %v353_v63 }
 0x11e   :  { %654 = vmatprep.subr.mxu1 %v770_v0 }
 0x11f   :  { %655 = vmatpush3.msra.mxu1 %v352_v1 }
 0x120   :  { %656 = vmatprep.subr.mxu1 %v770_v0 }
 0x121   :  { %657 = vmatpush3.msra.mxu1 %v351_v2 }
 0x122   :  { %658 = vmatprep.subr.mxu1 %v770_v0 }
 0x123   :  { %659 = vmatpush3.msra.mxu1 %v350_v3 }
 0x124   :  { %660 = vmatprep.subr.mxu1 %v770_v0 }
 0x125   :  { %661 = vmatpush3.msra.mxu1 %v349_v4 }
 0x126   :  { %662 = vmatprep.subr.mxu1 %v770_v0 }
 0x127   :  { %663 = vmatpush3.msra.mxu1 %v348_v10 }
 0x128   :  { %664 = vmatprep.subr.mxu1 %v770_v0 }
 0x129   :  { %665 = vmatpush3.msra.mxu1 %v347_v11 }
 0x12a   :  { %666 = vmatprep.subr.mxu1 %v770_v0 }
 0x12b   :  { %667 = vmatpush3.msra.mxu1 %v346_v12 }
 0x1cc   :  { %v244_v6 = vpop.f32.mrf.mxu1 }
 0x1cd   :  { %v245_v7 = vadd.f32 %v458_v5, %v244_v6 }
 0x1ce   :  { %v600_v8 = vpop.f32.mrf.mxu1 }
 0x1cf   :  { %v248_v9 = vmax.f32 %v245_v7, 0.0 }
 0x1d1   :  { %634 = vmatmul.mubr.f32.vlgmr.msra.gmra.mxu0 %v248_v9 }
 0x291   :  { %v340_v14 = vpop.f32.mrf.mxu0 }
 0x292   :  { %v341_v15 = vadd.f32 %v460_v13, %v340_v14 }
 0x293   :  { %v635_v16 = vpop.f32.mrf.mxu0 }
 0x294   :  { %v344_v17 = vmax.f32 %v341_v15, 0.0 }
 0x296   :  { %669 = vmatmul.mubr.f32.vlgmr.msra.gmra.mxu1 %v344_v17 }
 0x356   :  { %v436_v19 = vpop.f32.mrf.mxu1 }
 0x357   :  { %v437_v20 = vadd.f32 %v462_v18, %v436_v19 }
 0x358   :  { %v670_v0 = vpop.f32.mrf.mxu1 }
 0x359   :  { %440 = vst [vmem:[#allocation8] sm:$0xff] %v437_v20 }
 0x35a   :  { %750 = shalt.err (!%p747_p5)
}
 0x35b   :  { %450 = dma.vmem_to_hbm [thread:$0]  %s448_s15, 128, %s904_s5, [#allocation4]  }
 0x35c   :  { %763 = dma.done.wait [#allocation4], 128  }
 0x35d   :  { %764 = vsyncadd [#allocation4], 4294967168 }
 0x35e   :  { %454 = vsyncpa [#allocation3], 1 }
 0x35f   :  { %455 = vsyncpa [#allocation6], 1 }
 0x360   :  { %456 = vsyncpa [#allocation4], 1 }

</bundles_post_ra>
